<compile_context>
chip_gen: v7x
topology: tpu7x:2x2x1
jax: 0.10.0
libtpu: 0.0.40
codegen_flags: <defaults>
</compile_context>

<pallas_src>
import jax
import jax.numpy as jnp
from jax.experimental import pallas as pl
from jax.experimental.pallas import tpu as pltpu


def _unembed_matmul_kernel(x_ref, w_ref, b_ref, o_ref):
    # x_ref: (tm, K)   w_ref: (K, N)   b_ref: (N, 1)   o_ref: (N, tm)
    # Operand-swapped matmul: contract K of (K, N) with K of (tm, K) -> (N, tm)
    # so the output's last (lane) dim is the big M tile -> lane-dense stores.
    acc = jax.lax.dot_general(
        w_ref[...], x_ref[...],
        dimension_numbers=(((0,), (1,)), ((), ())),
        preferred_element_type=jnp.float32,
        precision=jax.lax.Precision.HIGHEST,
    )
    o_ref[...] = (acc + b_ref[...]).astype(o_ref.dtype)


def patch_unembed_forward(x, weight, bias, *, H, W, patch_size, out_chans,
                          tm_target=512):
    """x: (B, H*W, embed_dim); weight: (embed_dim, out_chans, p, p); bias: (out_chans,)

    Returns (B, out_chans, H*p, W*p) (NCHW), matching nn.ConvTranspose2d with
    kernel_size == stride == patch_size.
    """
    B, HW, C = x.shape
    p = patch_size
    assert HW == H * W
    assert weight.shape == (C, out_chans, p, p)

    M = B * HW                 # number of spatial positions
    K = C                      # embed_dim
    N = out_chans * p * p      # per-position output features (oc, i, j)

    x_flat = x.reshape(M, K)
    # (C, oc, p, p) -> (C, oc*p*p); column order is (oc, i, j) row-major.
    w_flat = weight.reshape(K, N)
    # bias per out-channel, broadcast over the p*p kernel taps, as a column
    # so it broadcasts over the lane (M-tile) axis of the (N, tm) output block.
    b_col = jnp.broadcast_to(bias[:, None, None], (out_chans, p, p)).reshape(N, 1)

    # Tile over M.  tm=512 is a multiple of 8 (sublane) and 128 (lane); mem-bound
    # kernels hit ~85% of HBM roofline at this tile size vs ~29% at 128.  VMEM per
    # step is tiny (tm*K + tm*N + K*N floats << 1 MiB), so this fits comfortably
    # within the default scoped VMEM limit on v5e/v6e/v7x.  For realistic M
    # (B * (img/p)^2 >= ~3k) the grid still has plenty of steps for both v7x
    # TensorCores; for tiny M we clamp tm to M (full-dim block is always legal).
    tm = tm_target if M >= tm_target else M
    grid = (pl.cdiv(M, tm),)   # ragged last block (if any) is masked by Pallas

    cost = pl.CostEstimate(
        flops=2 * M * K * N,
        transcendentals=0,
        bytes_accessed=4 * (M * K + K * N + N + M * N),
    )

    out_t = pl.pallas_call(
        _unembed_matmul_kernel,
        out_shape=jax.ShapeDtypeStruct((N, M), x.dtype),
        grid_spec=pltpu.PrefetchScalarGridSpec(
            num_scalar_prefetch=0,
            grid=grid,
            in_specs=[
                pl.BlockSpec((tm, K), lambda i: (i, 0)),
                pl.BlockSpec((K, N), lambda i: (0, 0)),   # resident, fetched once
                pl.BlockSpec((N, 1), lambda i: (0, 0)),   # resident, fetched once
            ],
            out_specs=pl.BlockSpec((N, tm), lambda i: (0, i)),
        ),
        compiler_params=pltpu.CompilerParams(
            dimension_semantics=("parallel",)),
        cost_estimate=cost,
    )(x_flat, w_flat, b_col)

    # Pixel-shuffle rearrangement (done in XLA, see TODO(synk) above):
    # (oc*p*p, B*H*W) -> (oc, p, p, B, H, W) -> (B, oc, H, p, W, p) -> NCHW
    out = out_t.reshape(out_chans, p, p, B, H, W)
    out = out.transpose(3, 0, 4, 1, 5, 2)
    out = out.reshape(B, out_chans, H * p, W * p)
    return out


if __name__ == "__main__":
    # Small but consistent config: img_size=16, patch_size=4 -> H=W=4, HW=16
    img_size = 16
    patch_size = 4
    embed_dim = 32
    out_chans = 3
    B = 2
    H = W = img_size // patch_size

    key = jax.random.PRNGKey(0)
    kx, kw, kb = jax.random.split(key, 3)

    x = jax.random.normal(kx, (B, H * W, embed_dim), dtype=jnp.float32)
    # ConvTranspose2d weight shape: (in_channels, out_channels, kH, kW)
    weight = 0.05 * jax.random.normal(
        kw, (embed_dim, out_chans, patch_size, patch_size), dtype=jnp.float32)
    bias = 0.01 * jax.random.normal(kb, (out_chans,), dtype=jnp.float32)

    out = patch_unembed_forward(
        x, weight, bias, H=H, W=W, patch_size=patch_size, out_chans=out_chans)
    out = jax.block_until_ready(out)

    # Reference: since kernel==stride, ConvTranspose2d places one independent
    # p x p patch per input pixel:
    #   out[b, oc, h*p+i, w*p+j] = sum_c x[b, h*W+w, c] * weight[c, oc, i, j] + bias[oc]
    xr = x.reshape(B, H, W, embed_dim)
    ref = jnp.einsum("bhwc,coij->bohiwj", xr, weight) + bias[None, :, None, None, None, None]
    ref = ref.reshape(B, out_chans, H * patch_size, W * patch_size)

    assert out.shape == (B, out_chans, H * patch_size, W * patch_size)
    assert jnp.allclose(out, ref, atol=1e-5, rtol=1e-5)
    print("KERNEL_OK")
</pallas_src>

<mosaic_0001>
module attributes {stable_mosaic.version = 11 : i64} {
  func.func @_unembed_matmul_kernel(%arg0: i32, %arg1: memref<32x32xf32, #tpu.memory_space<vmem>>, %arg2: memref<32x48xf32, #tpu.memory_space<vmem>>, %arg3: memref<48x1xf32, #tpu.memory_space<vmem>>, %arg4: memref<48x32xf32, #tpu.memory_space<vmem>>) attributes {dimension_semantics = [#tpu.dimension_semantics<parallel>], iteration_bounds = array<i64: 1>, scalar_prefetch = 0 : i64, scratch_operands = 0 : i64, tpu.core_type = #tpu.core_type<tc>, window_params = [{transform_indices = @transform_0, window_bounds = array<i64: 32, 32>}, {pipeline_mode = #tpu.pipeline_mode<synchronous>, transform_indices = @transform_1, window_bounds = array<i64: 32, 48>}, {pipeline_mode = #tpu.pipeline_mode<synchronous>, transform_indices = @transform_2, window_bounds = array<i64: 48, 1>}, {transform_indices = @transform_3, window_bounds = array<i64: 48, 32>}]} {
    %c0 = arith.constant 0 : index
    %c0_0 = arith.constant 0 : index
    %0 = vector.load %arg2[%c0, %c0_0] : memref<32x48xf32, #tpu.memory_space<vmem>>, vector<32x48xf32>
    %c0_1 = arith.constant 0 : index
    %c0_2 = arith.constant 0 : index
    %1 = vector.load %arg1[%c0_1, %c0_2] : memref<32x32xf32, #tpu.memory_space<vmem>>, vector<32x32xf32>
    %cst = arith.constant dense<0.000000e+00> : vector<48x32xf32>
    %2 = tpu.matmul %0, %1, %cst {dimension_numbers = #tpu.dot_dimension_numbers<[0], [1], [1], [0], [0, 1, 1, 0], [], []>, precision = #tpu.contract_precision<fp32>} : vector<32x48xf32>, vector<32x32xf32>, vector<48x32xf32> -> vector<48x32xf32>
    %c0_3 = arith.constant 0 : index
    %c0_4 = arith.constant 0 : index
    %3 = vector.load %arg3[%c0_3, %c0_4] : memref<48x1xf32, #tpu.memory_space<vmem>>, vector<48x1xf32>
    %4 = vector.broadcast %3 : vector<48x1xf32> to vector<48x32xf32>
    %5 = arith.addf %2, %4 : vector<48x32xf32>
    %c0_5 = arith.constant 0 : index
    %c0_6 = arith.constant 0 : index
    %6 = vector.load %arg4[%c0_5, %c0_6] : memref<48x32xf32, #tpu.memory_space<vmem>>, vector<48x32xf32>
    tpu.vector_store %arg4[%c0_5, %c0_6], %5 {strides = array<i32>} : memref<48x32xf32, #tpu.memory_space<vmem>>, vector<48x32xf32>,
    return
  }
  func.func @transform_0(%arg0: i32) -> (i32, i32) {
    %c0_i32 = arith.constant 0 : i32
    %c0_i32_0 = arith.constant 0 : i32
    return %arg0, %c0_i32 : i32, i32
  }
  func.func @transform_1(%arg0: i32) -> (i32, i32) {
    %c0_i32 = arith.constant 0 : i32
    %c0_i32_0 = arith.constant 0 : i32
    %c0_i32_1 = arith.constant 0 : i32
    return %c0_i32, %c0_i32_0 : i32, i32
  }
  func.func @transform_2(%arg0: i32) -> (i32, i32) {
    %c0_i32 = arith.constant 0 : i32
    %c0_i32_0 = arith.constant 0 : i32
    %c0_i32_1 = arith.constant 0 : i32
    return %c0_i32, %c0_i32_0 : i32, i32
  }
  func.func @transform_3(%arg0: i32) -> (i32, i32) {
    %c0_i32 = arith.constant 0 : i32
    %c0_i32_0 = arith.constant 0 : i32
    return %c0_i32, %arg0 : i32, i32
  }
}

</mosaic_0001>

<bundles_post_ra>
// kernel: tpu_custom_call.1
= control target key start
LH: loop header
LB: loop body
LE: loop exit
PB: predicated region body
PF: predicated region fallthrough
CT: control target
= control target key end

     0   :  { %8 = vsyncpa [#allocation3], 0  ;;  %s1123_s12 = smov [#allocation2]   ;;  %s1288_s0 = inlined_call_operand.vmem [shape: f32[32,32], index: 0, kind: input, shape index: {}]   ;;  %s1289_s1 = inlined_call_operand.hbm [shape: f32[32,48], index: 1, kind: input, shape index: {}]   ;;  %s1290_s2 = inlined_call_operand.vmem [shape: f32[48,1], index: 2, kind: input, shape index: {}]   ;;  %s1291_s3 = inlined_call_operand.vmem [shape: f32[48,32], index: 3, kind: output, shape index: {}]  }
   0x1   :  { %s16_s13 = sshll.u32 %s1123_s12, 4  ;;  %s1099_s16 = scalar_lea.hbm %s1289_s1, 512  ;;  %s17_s13 = int_to_ptr.vmem [resolvable:$true] %s16_s13 }
   0x2   :  { %p1100_p0 = scmp.ne.s32.totalorder %s1289_s1, %s1099_s16  ;;  %p1103_p1 = scmp.lt.u32.totalorder %s1099_s16, %s1289_s1 }
   0x4   :  { %p1105_p2 = pnand %p1103_p1, %p1100_p0 }
   0x6   :  { %1108 = shalt.err (!%p1105_p2)
}
   0x7   :  { %s1109_s21 = scalar_lea.vmem %s17_s13, 512  ;;  %p1114_p4 = scmp.lt.s32.totalorder %s17_s13, %s17_s13 }
   0x8   :  { %p1110_p3 = scmp.ne.s32.totalorder %s17_s13, %s1109_s21  ;;  %p1115_p5 = scmp.lt.s32.totalorder %s1109_s21, %s1109_s21 }
   0xa   :  { %p1116_p6 = por %p1115_p5, %p1114_p4 }
   0xc   :  { %p1117_p7 = pnand %p1116_p6, %p1110_p3 }
   0xe   :  { %1120 = shalt.err (!%p1117_p7)
}
   0xf   :  { %s1124_s22 = smov 128   ;;  %s1125_s23 = smov 8  }
  0x10   :  { %22 = dma.hbm_to_vmem [thread:$0]  %s1289_s1, 512, %s17_s13, [#allocation3], %s1124_s22, %s1124_s22, %s1125_s23  }
  0x11   :  { %1121 = dma.done.wait [#allocation3], 512  }
  0x12   :  { %1122 = vsyncadd [#allocation3], 4294966784  ;;  %vm104_vm0 = vcmask 261120   ;;  %v28_v0 = vld [vmem:[#allocation2] sm:$0xff]  ;;  %v33_v2 = vld [vmem:[%s1288_s0 + $0x8] sm:$0xff]  ;;  %v1126_v41 = vmov 0  }
  0x13   :  { %72 = vxpose.xlu0.b32.start [1/4] (short) (narrow) %v28_v0, 48  ;;  %v32_v1 = vld [vmem:[%s1288_s0] sm:$0xff]  ;;  %v29_v3 = vld [vmem:[#allocation2 + $0x8] sm:$0xff]  ;;  %v127_v5 = vsel %vm104_vm0, %v33_v2, 0  ;;  %v34_v6 = vld [vmem:[%s1288_s0 + $0x10] sm:$0xff]  ;;  %1097 = vset.pattern.permute.xlu1 %v1126_v41 }
  0x14   :  { %v124_v4 = vsel %vm104_vm0, %v32_v1, 0  ;;  %v35_v7 = vld [vmem:[%s1288_s0 + $0x18] sm:$0xff]  ;;  %v139_v9 = vand.u32 4294901760, %v127_v5  ;;  %v130_v10 = vsel %vm104_vm0, %v34_v6, 0  ;;  %v30_v15 = vld [vmem:[#allocation2 + $0x10] sm:$0xff]  ;;  %v36_v40 = vld [vmem:[%s1290_s2] sm:$0xff] }
  0x15   :  { %v136_v8 = vand.u32 4294901760, %v124_v4  ;;  %v133_v11 = vsel %vm104_vm0, %v35_v7, 0  ;;  %v142_v12 = vand.u32 4294901760, %v130_v10  ;;  %v31_v17 = vld [vmem:[#allocation2 + $0x18] sm:$0xff]  ;;  %v40_v42 = vld [vmem:[%s1290_s2 + $0x20] sm:$0xff]  ;;  %44 = vperm.xlu1 %1097, %v36_v40   ;;  %v37_v43 = vld [vmem:[%s1290_s2 + $0x8] sm:$0xff] }
  0x16   :  { %v145_v13 = vand.u32 4294901760, %v133_v11  ;;  %v273_v19 = vsub.f32 %v127_v5, %v139_v9  ;;  %v38_v44 = vld [vmem:[%s1290_s2 + $0x10] sm:$0xff]  ;;  %v39_v45 = vld [vmem:[%s1290_s2 + $0x18] sm:$0xff]  ;;  %v41_v46 = vld [vmem:[%s1290_s2 + $0x28] sm:$0xff] }
  0x17   :  { %73 = vxpose.xlu0.b32.cont [2/4] (short) (narrow) %v29_v3, 48  ;;  %v1175_v14 = vpack.c.bf16 %v139_v9, %v136_v8  ;;  %v266_v18 = vsub.f32 %v124_v4, %v136_v8  ;;  %v280_v28 = vsub.f32 %v130_v10, %v142_v12 }
  0x18   :  { %v1177_v16 = vpack.c.bf16 %v145_v13, %v142_v12  ;;  %v274_v21 = vand.u32 4294901760, %v273_v19  ;;  %v287_v29 = vsub.f32 %v133_v11, %v145_v13 }
  0x19   :  { %1033 = vmatprep.subr.bf16.mxu0 %v1175_v14  ;;  %1009 = vmatprep.subr.bf16.mxu1 %v1175_v14  ;;  %v267_v20 = vand.u32 4294901760, %v266_v18  ;;  %v281_v30 = vand.u32 4294901760, %v280_v28  ;;  %v1191_v38 = vpack.c.bf16 %v273_v19, %v266_v18 }
  0x1a   :  { %1035 = vmatpush3.bf16.xpose.msra.mxu0 %v1175_v14  ;;  %1011 = vmatpush3.bf16.xpose.msra.mxu1 %v1175_v14  ;;  %v275_v24 = vsub.f32 %v273_v19, %v274_v21  ;;  %v288_v31 = vand.u32 4294901760, %v287_v29  ;;  %v1193_v39 = vpack.c.bf16 %v287_v29, %v280_v28 }
  0x1b   :  { %74 = vxpose.xlu0.b32.cont [3/4] (short) (narrow) %v30_v15, 48  ;;  %1037 = vmatprep.subr.bf16.mxu0 %v1177_v16  ;;  %v1040_v22 = vpack.c.bf16 %v274_v21, %v267_v20  ;;  %v268_v23 = vsub.f32 %v266_v18, %v267_v20  ;;  %v282_v33 = vsub.f32 %v280_v28, %v281_v30 }
  0x1c   :  { %1013 = vmatprep.subr.bf16.mxu1 %v1177_v16  ;;  %v276_v26 = vand.u32 4294901760, %v275_v24  ;;  %v1187_v32 = vpack.c.bf16 %v288_v31, %v281_v30  ;;  %v289_v34 = vsub.f32 %v287_v29, %v288_v31  ;;  %49 = vperm.xlu1 %1097, %v37_v43  }
  0x1d   :  { %v269_v25 = vand.u32 4294901760, %v268_v23  ;;  %v283_v35 = vand.u32 4294901760, %v282_v33 }
  0x1e   :  { %v290_v36 = vand.u32 4294901760, %v289_v34 }
  0x1f   :  { %75 = vxpose.xlu0.b32.end [4/4] (short) (narrow) %v31_v17, 48  ;;  %v1016_v27 = vpack.c.bf16 %v276_v26, %v269_v25 }
  0x20   :  { %v1189_v37 = vpack.c.bf16 %v290_v36, %v283_v35  ;;  %54 = vperm.xlu1 %1097, %v38_v44  }
  0x22   :  { %1039 = vmatpush3.bf16.xpose.msra.mxu0 %v1177_v16  ;;  %1015 = vmatpush3.bf16.xpose.msra.mxu1 %v1177_v16 }
  0x23   :  { %1041 = vmatprep.subr.bf16.mxu0 %v1040_v22  ;;  %1017 = vmatprep.subr.bf16.mxu1 %v1016_v27 }
  0x24   :  { %59 = vperm.xlu1 %1097, %v39_v45  }
  0x28   :  { %69 = vperm.xlu1 %1097, %v41_v46  }
  0x48   :  { %1098 = vset.pattern.permute.xlu0 %v1126_v41 }
  0x50   :  { %64 = vperm.xlu0 %1098, %v40_v42  }
  0x93   :  { %v88_v47 = vpop.trf.xlu0 }
  0x94   :  { %v106_v48 = vsel %vm104_vm0, %v88_v47, 0 }
  0x95   :  { %v1214_v49 = vand.u32 4294901760, %v106_v48 }
  0x97   :  { %v1217_v50 = vsub.f32 %v106_v48, %v1214_v49  ;;  %v89_v51 = vpop.trf.xlu0 }
  0x98   :  { %v109_v52 = vsel %vm104_vm0, %v89_v51, 0 }
  0x99   :  { %v1220_v53 = vand.u32 4294901760, %v109_v52  ;;  %v206_v54 = vand.u32 4294901760, %v1217_v50 }
  0x9b   :  { %v1224_v55 = vsub.f32 %v109_v52, %v1220_v53  ;;  %965 = vmatprep.mubr.f32.mxu0 %v206_v54  ;;  %v90_v56 = vpop.trf.xlu0  ;;  %v207_v57 = vsub.f32 %v1217_v50, %v206_v54 }
  0x9c   :  { %v112_v58 = vsel %vm104_vm0, %v90_v56, 0 }
  0x9d   :  { %v1228_v59 = vand.u32 4294901760, %v112_v58  ;;  %v208_v60 = vand.u32 4294901760, %v207_v57  ;;  %v216_v61 = vand.u32 4294901760, %v1224_v55 }
  0x9f   :  { %v1232_v62 = vsub.f32 %v112_v58, %v1228_v59  ;;  %914 = vmatprep.mubr.f32.mxu1 %v208_v60  ;;  %966 = vmatmul.mubr.f32.vlgmr.msra.gmra.mrb[0].mxu0 %v216_v61  ;;  %v91_v63 = vpop.trf.xlu0  ;;  %v217_v0 = vsub.f32 %v1224_v55, %v216_v61 }
  0xa0   :  { %v115_v1 = vsel %vm104_vm0, %v91_v63, 0  ;;  %1043 = vmatpush3.bf16.xpose.msra.mxu0 %v1040_v22 }
  0xa1   :  { %v234_v2 = vand.u32 4294901760, %v115_v1  ;;  %v218_v3 = vand.u32 4294901760, %v217_v0  ;;  %v226_v4 = vand.u32 4294901760, %v1232_v62  ;;  %1045 = vmatprep.subr.bf16.mxu0 %v1187_v32 }
  0xa3   :  { %v235_v5 = vsub.f32 %v115_v1, %v234_v2  ;;  %915 = vmatmul.mubr.f32.vlgmr.msra.gmra.mrb[0].mxu1 %v218_v3  ;;  %968 = vmatprep.mubr.f32.mxu0 %v226_v4  ;;  %v92_v6 = vpop.trf.xlu0  ;;  %v227_v7 = vsub.f32 %v1232_v62, %v226_v4 }
  0xa4   :  { %v118_v8 = vsel %vm104_vm0, %v92_v6, 0  ;;  %1019 = vmatpush3.bf16.xpose.msra.mxu1 %v1016_v27 }
  0xa5   :  { %v244_v9 = vand.u32 4294901760, %v118_v8  ;;  %v228_v10 = vand.u32 4294901760, %v227_v7  ;;  %v236_v11 = vand.u32 4294901760, %v235_v5  ;;  %1021 = vmatprep.subr.bf16.mxu1 %v1189_v37 }
  0xa7   :  { %v245_v12 = vsub.f32 %v118_v8, %v244_v9  ;;  %917 = vmatprep.mubr.f32.mxu1 %v228_v10  ;;  %969 = vmatmul.mubr.f32.gmra.mrb[2].mxu0 %v236_v11  ;;  %v93_v13 = vpop.trf.xlu0  ;;  %v237_v15 = vsub.f32 %v235_v5, %v236_v11 }
  0xa8   :  { %v121_v17 = vsel %vm104_vm0, %v93_v13, 0  ;;  %1047 = vmatpush3.bf16.xpose.msra.mxu0 %v1187_v32 }
  0xa9   :  { %v254_v18 = vand.u32 4294901760, %v121_v17  ;;  %v238_v19 = vand.u32 4294901760, %v237_v15  ;;  %v246_v20 = vand.u32 4294901760, %v245_v12  ;;  %1049 = vmatprep.subr.bf16.mxu0 %v1175_v14 }
  0xab   :  { %v255_v21 = vsub.f32 %v121_v17, %v254_v18  ;;  %918 = vmatmul.mubr.f32.gmra.mrb[2].mxu1 %v238_v19  ;;  %971 = vmatprep.mubr.f32.mxu0 %v246_v20  ;;  %v247_v22 = vsub.f32 %v245_v12, %v246_v20 }
  0xac   :  { %1023 = vmatpush3.bf16.xpose.msra.mxu1 %v1189_v37 }
  0xad   :  { %v248_v23 = vand.u32 4294901760, %v247_v22  ;;  %v256_v24 = vand.u32 4294901760, %v255_v21  ;;  %1025 = vmatprep.subr.bf16.mxu1 %v1191_v38 }
  0xaf   :  { %920 = vmatprep.mubr.f32.mxu1 %v248_v23  ;;  %972 = vmatmul.mubr.f32.gmra.mrb[4].mxu0 %v256_v24  ;;  %v257_v25 = vsub.f32 %v255_v21, %v256_v24 }
  0xb0   :  { %982 = vmatprep.mubr.f32.mxu0 %v1214_v49 }
  0xb1   :  { %v258_v26 = vand.u32 4294901760, %v257_v25 }
  0xb3   :  { %921 = vmatmul.mubr.f32.gmra.mrb[4].mxu1 %v258_v26  ;;  %983 = vmatmul.mubr.f32.vlgmr.msra.gmra.mrb[0].mxu0 %v1220_v53 }
  0xb4   :  { %1051 = vmatpush3.bf16.xpose.msra.mxu0 %v1175_v14  ;;  %931 = vmatprep.mubr.f32.mxu1 %v1214_v49  ;;  %v45_v14 = vpop.permute.xlu1 %44 }
  0xb5   :  { %985 = vmatprep.mubr.f32.mxu0 %v1228_v59  ;;  %1053 = vmatprep.subr.bf16.mxu0 %v1177_v16 }
  0xb7   :  { %932 = vmatmul.mubr.f32.vlgmr.msra.gmra.mrb[0].mxu1 %v1220_v53  ;;  %986 = vmatmul.mubr.f32.gmra.mrb[2].mxu0 %v234_v2 }
  0xb8   :  { %1027 = vmatpush3.bf16.xpose.msra.mxu1 %v1191_v38  ;;  %934 = vmatprep.mubr.f32.mxu1 %v1228_v59 }
  0xb9   :  { %988 = vmatprep.mubr.f32.mxu0 %v244_v9  ;;  %1029 = vmatprep.subr.bf16.mxu1 %v1193_v39 }
  0xbb   :  { %935 = vmatmul.mubr.f32.gmra.mrb[2].mxu1 %v234_v2  ;;  %989 = vmatmul.mubr.f32.gmra.mrb[4].mxu0 %v254_v18 }
  0xbc   :  { %1055 = vmatpush3.bf16.xpose.msra.mxu0 %v1177_v16  ;;  %937 = vmatprep.mubr.f32.mxu1 %v244_v9  ;;  %v50_v16 = vpop.permute.xlu1 %49 }
  0xbd   :  { %999 = vmatprep.mubr.f32.mxu0 %v1214_v49 }
  0xbf   :  { %938 = vmatmul.mubr.f32.gmra.mrb[4].mxu1 %v254_v18 }
  0xc0   :  { %1031 = vmatpush3.bf16.xpose.msra.mxu1 %v1193_v39  ;;  %948 = vmatprep.mubr.f32.mxu1 %v1217_v50  ;;  %v55_v27 = vpop.permute.xlu1 %54 }
  0xc3   :  { %1000 = vmatmul.mubr.f32.vlgmr.msra.gmra.mrb[0].mxu0 %v1220_v53 }
  0xc4   :  { %1002 = vmatprep.mubr.f32.mxu0 %v1228_v59  ;;  %v60_v35 = vpop.permute.xlu1 %59 }
  0xc7   :  { %949 = vmatmul.mubr.f32.vlgmr.msra.gmra.mrb[0].mxu1 %v1224_v55  ;;  %1003 = vmatmul.mubr.f32.gmra.mrb[2].mxu0 %v234_v2 }
  0xc8   :  { %951 = vmatprep.mubr.f32.mxu1 %v1232_v62  ;;  %1005 = vmatprep.mubr.f32.mxu0 %v244_v9  ;;  %v70_v47 = vpop.permute.xlu1 %69 }
  0xcb   :  { %952 = vmatmul.mubr.f32.gmra.mrb[2].mxu1 %v235_v5  ;;  %1006 = vmatmul.mubr.f32.gmra.mrb[4].mxu0 %v254_v18 }
  0xcc   :  { %954 = vmatprep.mubr.f32.mxu1 %v245_v12 }
  0xcf   :  { %955 = vmatmul.mubr.f32.gmra.mrb[4].mxu1 %v255_v21  ;;  %v65_v46 = vpop.permute.xlu0 %64 }
 0x196   :  { %v1001_v28 = vpop.f32.mrb[0].mxu0 }
 0x197   :  { %v801_v29 = vpop.f32.mrb[1].mxu0 }
 0x19a   :  { %v950_v30 = vpop.f32.mrb[0].mxu1  ;;  %v1004_v31 = vpop.f32.mrb[2].mxu0 }
 0x19b   :  { %v1056_v32 = vadd.f32 %v950_v30, %v50_v16  ;;  %v461_v33 = vpop.f32.mrb[1].mxu1  ;;  %v813_v34 = vpop.f32.mrb[3].mxu0 }
 0x19c   :  { %v1058_v36 = vadd.f32 %v461_v33, %v45_v14 }
 0x19d   :  { %v1057_v37 = vadd.f32 %v1056_v32, %v1001_v28 }
 0x19e   :  { %v1059_v38 = vadd.f32 %v1058_v36, %v801_v29  ;;  %v953_v39 = vpop.f32.mrb[2].mxu1  ;;  %v1007_v40 = vpop.f32.mrb[4].mxu0 }
 0x19f   :  { %836 = vst.msk [vmem:[%s1291_s3 + $0x8] sm:$0xff] %vm104_vm0, %v1057_v37  ;;  %v1060_v41 = vadd.f32 %v953_v39, %v60_v35  ;;  %v475_v42 = vpop.f32.mrb[3].mxu1  ;;  %v825_v43 = vpop.f32.mrb[5].mxu0 }
 0x1a0   :  { %835 = vst.msk [vmem:[%s1291_s3] sm:$0xff] %vm104_vm0, %v1059_v38  ;;  %v1062_v44 = vadd.f32 %v475_v42, %v55_v27 }
 0x1a1   :  { %v1061_v45 = vadd.f32 %v1060_v41, %v1004_v31 }
 0x1a2   :  { %v1063_v48 = vadd.f32 %v1062_v44, %v813_v34  ;;  %v956_v49 = vpop.f32.mrb[4].mxu1 }
 0x1a3   :  { %838 = vst.msk [vmem:[%s1291_s3 + $0x18] sm:$0xff] %vm104_vm0, %v1061_v45  ;;  %v1064_v50 = vadd.f32 %v956_v49, %v70_v47  ;;  %v489_v51 = vpop.f32.mrb[5].mxu1 }
 0x1a4   :  { %837 = vst.msk [vmem:[%s1291_s3 + $0x10] sm:$0xff] %vm104_vm0, %v1063_v48  ;;  %v1066_v52 = vadd.f32 %v489_v51, %v65_v46 }
 0x1a5   :  { %v1065_v53 = vadd.f32 %v1064_v50, %v1007_v40 }
 0x1a6   :  { %v1067_v54 = vadd.f32 %v1066_v52, %v825_v43 }
 0x1a7   :  { %840 = vst.msk [vmem:[%s1291_s3 + $0x28] sm:$0xff] %vm104_vm0, %v1065_v53 }
 0x1a8   :  { %839 = vst.msk [vmem:[%s1291_s3 + $0x20] sm:$0xff] %vm104_vm0, %v1067_v54 }
 0x1a9   :  { %845 = vsyncpa [#allocation3], 1 }

</bundles_post_ra>
